<compile_context>
chip_gen: v6e
topology: v6e:2x2x1
jax: 0.10.0
libtpu: 0.0.40
codegen_flags: <defaults>
</compile_context>

<pallas_src>
import jax
import jax.numpy as jnp
import numpy as np
from jax.experimental import pallas as pl
from jax.experimental.pallas import tpu as pltpu


def _attention_kernel(hb_ref, enc_ref, we_ref, wv_ref, ctx_ref, aw_ref):
    tb, S, H = enc_ref.shape
    enc = enc_ref[...]                                        # (TB, S, H)

    # One MXU matmul with M = TB*S rows: enc @ W_e
    pre = jnp.dot(enc.reshape(tb * S, H), we_ref[...],
                  preferred_element_type=jnp.float32)         # (TB*S, H)
    # Broadcast-add the precomputed hidden projection (hidden @ W_h + b).
    pre = pre.reshape(tb, S, H) + hb_ref[...][:, None, :]     # (TB, S, H)
    t = jnp.tanh(pre)

    # v-projection as VPU multiply + lane reduce -> lane-dense (TB, S) scores.
    scores = jnp.sum(t * wv_ref[...], axis=-1)                # (TB, S)

    # Softmax over the sequence axis (lane axis).
    m = jnp.max(scores, axis=-1, keepdims=True)
    e = jnp.exp(scores - m)
    w = e / jnp.sum(e, axis=-1, keepdims=True)                # (TB, S)
    aw_ref[...] = w

    # context[b, :] = sum_s w[b, s] * enc[b, s, :]  (broadcast-mul + sublane reduce)
    ctx_ref[...] = jnp.sum(w[:, :, None] * enc, axis=1)       # (TB, H)


def _choose_batch_tile(B, S, target_rows=256):
    """Pick TB so TB*S >= target_rows (MXU-friendly), with (8,*) block alignment."""
    tb = -(-target_rows // S)           # ceil(target_rows / S)
    if tb >= B:
        return B                        # single tile == full batch (block dim == full dim)
    tb = ((tb + 7) // 8) * 8            # multiple of 8 for sublane-aligned 2D blocks
    return min(tb, B)


def attention_forward(hidden, encoder_outputs, w_attn, b_attn, w_v):
    """
    hidden:          (B, H)
    encoder_outputs: (B, S, H)
    w_attn:          (H, 2H)  PyTorch nn.Linear weight (out_features, in_features)
    b_attn:          (H,)
    w_v:             (1, H)   PyTorch nn.Linear weight, no bias
    returns: output (B, 2H), attn_weights (B, S, 1)
    """
    B, S, H = encoder_outputs.shape

    # Split PyTorch-layout weight for y = x @ W.T + b. Concat order is (hidden, enc):
    # first H input columns act on `hidden`, last H on `enc`.
    w_attn_t = w_attn.T                      # (2H, H)
    wh = w_attn_t[:H, :]                     # (H, H) applied to hidden
    we = w_attn_t[H:, :]                     # (H, H) applied to encoder outputs
    wv_row = w_v.reshape(1, H)               # (1, H) kept as a lane-dense row

    # Hoisted hidden projection: one (B,H)@(H,H) matmul instead of B M=1 matmuls.
    hb = jnp.dot(hidden, wh, preferred_element_type=jnp.float32) + b_attn[None, :]

    # Batch tiling (pad B to a multiple of TB if needed; padded rows are discarded).
    tb = _choose_batch_tile(B, S)
    nb = pl.cdiv(B, tb)
    Bp = nb * tb
    if Bp != B:
        pad = Bp - B
        hb_p = jnp.pad(hb, ((0, pad), (0, 0)))
        enc_p = jnp.pad(encoder_outputs, ((0, pad), (0, 0), (0, 0)))
    else:
        hb_p = hb
        enc_p = encoder_outputs

    ctx, aw = pl.pallas_call(
        _attention_kernel,
        out_shape=(
            jax.ShapeDtypeStruct((Bp, H), jnp.float32),   # context
            jax.ShapeDtypeStruct((Bp, S), jnp.float32),   # attn weights (lane-dense)
        ),
        grid_spec=pltpu.PrefetchScalarGridSpec(
            num_scalar_prefetch=0,
            grid=(nb,),
            in_specs=[
                pl.BlockSpec((tb, H), lambda b: (b, 0)),        # hb = hidden@W_h + bias
                pl.BlockSpec((tb, S, H), lambda b: (b, 0, 0)),  # encoder_outputs tile
                pl.BlockSpec((H, H), lambda b: (0, 0)),         # W_e (grid-constant)
                pl.BlockSpec((1, H), lambda b: (0, 0)),         # w_v row (grid-constant)
            ],
            out_specs=[
                pl.BlockSpec((tb, H), lambda b: (b, 0)),
                pl.BlockSpec((tb, S), lambda b: (b, 0)),
            ],
        ),
        compiler_params=pltpu.CompilerParams(
            dimension_semantics=("parallel",)),
    )(hb_p, enc_p, we, wv_row)

    ctx = ctx[:B]
    aw = aw[:B]

    output = jnp.concatenate([ctx, hidden], axis=1)             # (B, 2H) — concat in XLA
    return output, aw.reshape(B, S, 1)


def attention_reference(hidden, encoder_outputs, w_attn, b_attn, w_v):
    """Pure-JAX reference mirroring the PyTorch forward exactly."""
    B, S, H = encoder_outputs.shape
    hid_rep = jnp.repeat(hidden[:, None, :], S, axis=1)             # (B, S, H)
    cat = jnp.concatenate([hid_rep, encoder_outputs], axis=2)       # (B, S, 2H)
    pre = jnp.einsum("bsk,hk->bsh", cat, w_attn) + b_attn           # (B, S, H)
    scores = jnp.einsum("bsh,oh->bso", jnp.tanh(pre), w_v)          # (B, S, 1)
    aw = jax.nn.softmax(scores, axis=1)                             # (B, S, 1)
    ctx = jnp.einsum("bso,bsh->boh", aw, encoder_outputs)[:, 0, :]  # (B, H)
    out = jnp.concatenate([ctx, hidden], axis=1)                    # (B, 2H)
    return out, aw


if __name__ == "__main__":
    B, S, H = 2, 8, 32

    key = jax.random.PRNGKey(0)
    k1, k2, k3, k4, k5 = jax.random.split(key, 5)

    # PyTorch Linear layouts: (out_features, in_features).
    w_attn = jax.random.normal(k1, (H, 2 * H), jnp.float32) * 0.1
    b_attn = jax.random.normal(k2, (H,), jnp.float32) * 0.1
    w_v = jax.random.normal(k3, (1, H), jnp.float32) * 0.1

    hidden = jax.random.normal(k4, (B, H), jnp.float32)
    encoder_outputs = jax.random.normal(k5, (B, S, H), jnp.float32)

    out, aw = attention_forward(hidden, encoder_outputs, w_attn, b_attn, w_v)
    out = jax.block_until_ready(out)
    aw = jax.block_until_ready(aw)

    out_ref, aw_ref = attention_reference(hidden, encoder_outputs, w_attn, b_attn, w_v)

    assert out.shape == (B, 2 * H) and aw.shape == (B, S, 1)
    np.testing.assert_allclose(np.asarray(out), np.asarray(out_ref), rtol=1e-5, atol=1e-5)
    np.testing.assert_allclose(np.asarray(aw), np.asarray(aw_ref), rtol=1e-5, atol=1e-5)

    print("KERNEL_OK")
</pallas_src>

<mosaic_0001>
module attributes {stable_mosaic.version = 11 : i64} {
  func.func @_attention_kernel(%arg0: i32, %arg1: memref<2x32xf32, #tpu.memory_space<vmem>>, %arg2: memref<2x8x32xf32, #tpu.memory_space<vmem>>, %arg3: memref<32x32xf32, #tpu.memory_space<vmem>>, %arg4: memref<1x32xf32, #tpu.memory_space<vmem>>, %arg5: memref<2x32xf32, #tpu.memory_space<vmem>>, %arg6: memref<2x8xf32, #tpu.memory_space<vmem>>) attributes {dimension_semantics = [#tpu.dimension_semantics<parallel>], iteration_bounds = array<i64: 1>, scalar_prefetch = 0 : i64, scratch_operands = 0 : i64, tpu.core_type = #tpu.core_type<tc>, window_params = [{transform_indices = @transform_0, window_bounds = array<i64: 2, 32>}, {transform_indices = @transform_1, window_bounds = array<i64: 2, 8, 32>}, {pipeline_mode = #tpu.pipeline_mode<synchronous>, transform_indices = @transform_2, window_bounds = array<i64: 32, 32>}, {pipeline_mode = #tpu.pipeline_mode<synchronous>, transform_indices = @transform_3, window_bounds = array<i64: 1, 32>}, {transform_indices = @transform_4, window_bounds = array<i64: 2, 32>}, {transform_indices = @transform_5, window_bounds = array<i64: 2, 8>}]} {
    %c0 = arith.constant 0 : index
    %c0_0 = arith.constant 0 : index
    %c0_1 = arith.constant 0 : index
    %0 = vector.load %arg2[%c0, %c0_0, %c0_1] : memref<2x8x32xf32, #tpu.memory_space<vmem>>, vector<2x8x32xf32>
    %1 = vector.shape_cast %0 : vector<2x8x32xf32> to vector<16x32xf32>
    %c0_2 = arith.constant 0 : index
    %c0_3 = arith.constant 0 : index
    %2 = vector.load %arg3[%c0_2, %c0_3] : memref<32x32xf32, #tpu.memory_space<vmem>>, vector<32x32xf32>
    %cst = arith.constant dense<0.000000e+00> : vector<16x32xf32>
    %3 = tpu.matmul %1, %2, %cst {dimension_numbers = #tpu.dot_dimension_numbers<[1], [0], [0], [1], [0, 0, 1, 1], [], []>} : vector<16x32xf32>, vector<32x32xf32>, vector<16x32xf32> -> vector<16x32xf32>
    %4 = vector.shape_cast %3 : vector<16x32xf32> to vector<2x8x32xf32>
    %c0_4 = arith.constant 0 : index
    %c0_5 = arith.constant 0 : index
    %5 = vector.load %arg1[%c0_4, %c0_5] : memref<2x32xf32, #tpu.memory_space<vmem>>, vector<2x32xf32>
    %6 = vector.shape_cast %5 : vector<2x32xf32> to vector<2x1x32xf32>
    %7 = vector.broadcast %6 : vector<2x1x32xf32> to vector<2x8x32xf32>
    %8 = arith.addf %4, %7 : vector<2x8x32xf32>
    %9 = math.tanh %8 : vector<2x8x32xf32>
    %c0_6 = arith.constant 0 : index
    %c0_7 = arith.constant 0 : index
    %10 = vector.load %arg4[%c0_6, %c0_7] : memref<1x32xf32, #tpu.memory_space<vmem>>, vector<1x32xf32>
    %11 = vector.shape_cast %10 : vector<1x32xf32> to vector<1x1x32xf32>
    %12 = vector.broadcast %11 : vector<1x1x32xf32> to vector<2x8x32xf32>
    %13 = arith.mulf %9, %12 : vector<2x8x32xf32>
    %cst_8 = arith.constant dense<0.000000e+00> : vector<2x8xf32>
    %14 = vector.multi_reduction <add>, %13, %cst_8 [2] : vector<2x8x32xf32> to vector<2x8xf32>
    %cst_9 = arith.constant dense<0xFF800000> : vector<2xf32>
    %15 = vector.multi_reduction <maximumf>, %14, %cst_9 [1] : vector<2x8xf32> to vector<2xf32>
    %16 = vector.shape_cast %15 : vector<2xf32> to vector<2x1xf32>
    %17 = vector.broadcast %16 : vector<2x1xf32> to vector<2x8xf32>
    %18 = arith.subf %14, %17 : vector<2x8xf32>
    %19 = math.exp %18 : vector<2x8xf32>
    %cst_10 = arith.constant dense<0.000000e+00> : vector<2xf32>
    %20 = vector.multi_reduction <add>, %19, %cst_10 [1] : vector<2x8xf32> to vector<2xf32>
    %21 = vector.shape_cast %20 : vector<2xf32> to vector<2x1xf32>
    %22 = vector.broadcast %21 : vector<2x1xf32> to vector<2x8xf32>
    %23 = arith.divf %19, %22 : vector<2x8xf32>
    %c0_11 = arith.constant 0 : index
    %c0_12 = arith.constant 0 : index
    %24 = vector.load %arg6[%c0_11, %c0_12] : memref<2x8xf32, #tpu.memory_space<vmem>>, vector<2x8xf32>
    tpu.vector_store %arg6[%c0_11, %c0_12], %23 {strides = array<i32>} : memref<2x8xf32, #tpu.memory_space<vmem>>, vector<2x8xf32>,
    %25 = vector.shape_cast %23 : vector<2x8xf32> to vector<2x8x1xf32>
    %26 = vector.broadcast %25 : vector<2x8x1xf32> to vector<2x8x32xf32>
    %27 = arith.mulf %26, %0 : vector<2x8x32xf32>
    %cst_13 = arith.constant dense<0.000000e+00> : vector<2x32xf32>
    %28 = vector.multi_reduction <add>, %27, %cst_13 [1] : vector<2x8x32xf32> to vector<2x32xf32>
    %c0_14 = arith.constant 0 : index
    %c0_15 = arith.constant 0 : index
    %29 = vector.load %arg5[%c0_14, %c0_15] : memref<2x32xf32, #tpu.memory_space<vmem>>, vector<2x32xf32>
    tpu.vector_store %arg5[%c0_14, %c0_15], %28 {strides = array<i32>} : memref<2x32xf32, #tpu.memory_space<vmem>>, vector<2x32xf32>,
    return
  }
  func.func @transform_0(%arg0: i32) -> (i32, i32) {
    %c0_i32 = arith.constant 0 : i32
    %c0_i32_0 = arith.constant 0 : i32
    return %arg0, %c0_i32 : i32, i32
  }
  func.func @transform_1(%arg0: i32) -> (i32, i32, i32) {
    %c0_i32 = arith.constant 0 : i32
    %c0_i32_0 = arith.constant 0 : i32
    %c0_i32_1 = arith.constant 0 : i32
    return %arg0, %c0_i32, %c0_i32_0 : i32, i32, i32
  }
  func.func @transform_2(%arg0: i32) -> (i32, i32) {
    %c0_i32 = arith.constant 0 : i32
    %c0_i32_0 = arith.constant 0 : i32
    %c0_i32_1 = arith.constant 0 : i32
    return %c0_i32, %c0_i32_0 : i32, i32
  }
  func.func @transform_3(%arg0: i32) -> (i32, i32) {
    %c0_i32 = arith.constant 0 : i32
    %c0_i32_0 = arith.constant 0 : i32
    %c0_i32_1 = arith.constant 0 : i32
    return %c0_i32, %c0_i32_0 : i32, i32
  }
  func.func @transform_4(%arg0: i32) -> (i32, i32) {
    %c0_i32 = arith.constant 0 : i32
    %c0_i32_0 = arith.constant 0 : i32
    return %arg0, %c0_i32 : i32, i32
  }
  func.func @transform_5(%arg0: i32) -> (i32, i32) {
    %c0_i32 = arith.constant 0 : i32
    %c0_i32_0 = arith.constant 0 : i32
    return %arg0, %c0_i32 : i32, i32
  }
}

</mosaic_0001>

<bundles_post_ra>
// kernel: tpu_custom_call.1
= control target key start
LH: loop header
LB: loop body
LE: loop exit
PB: predicated region body
PF: predicated region fallthrough
CT: control target
= control target key end

     0   :  { %11 = vsyncpa [#allocation3], 0  ;;  %s576_s0 = inlined_call_operand.hbm [shape: f32[2,32], index: 0, kind: input, shape index: {}]   ;;  %s577_s1 = inlined_call_operand.hbm [shape: f32[2,8,32], index: 1, kind: input, shape index: {}]   ;;  %s578_s2 = inlined_call_operand.hbm [shape: f32[32,32], index: 2, kind: input, shape index: {}]   ;;  %s579_s3 = inlined_call_operand.vmem [shape: f32[1,32], index: 3, kind: input, shape index: {}]   ;;  %s580_s4 = inlined_call_operand.hbm [shape: f32[2,32], index: 4, kind: output, shape index: {0}]   ;;  %s581_s5 = inlined_call_operand.hbm [shape: f32[2,8], index: 5, kind: output, shape index: {1}]  }
   0x1   :  { %12 = vsyncpa [#allocation6], 0 }
   0x2   :  { %13 = vsyncpa [#allocation4], 0 }
   0x3   :  { %14 = vsyncpa [#allocation10], 0  ;;  %s498_s18 = smov [#allocation5]  }
   0x4   :  { %s30_s19 = sshll.u32 %s498_s18, 4  ;;  %s31_s19 = int_to_ptr.vmem [resolvable:$true] %s30_s19 }
   0x5   :  { %s398_s20 = scalar_lea.vmem %s31_s19, 256  ;;  %p403_p1 = scmp.lt.s32.totalorder %s31_s19, %s31_s19 }
   0x6   :  { %p399_p0 = scmp.ne.s32.totalorder %s31_s19, %s398_s20  ;;  %p404_p2 = scmp.lt.s32.totalorder %s398_s20, %s398_s20 }
   0x8   :  { %p405_p3 = por %p404_p2, %p403_p1 }
   0xa   :  { %p406_p4 = pnand %p405_p3, %p399_p0 }
   0xc   :  { %409 = shalt.err (!%p406_p4)
}
   0xd   :  { %s499_s21 = smov 128   ;;  %s500_s22 = smov 8  }
   0xe   :  { %36 = dma.hbm_to_vmem [thread:$0]  %s577_s1, 256, %s31_s19, [#allocation6], %s499_s21, %s499_s21, %s500_s22  }
   0xf   :  { %s501_s25 = smov [#allocation2]   ;;  %s502_s27 = smov [#allocation7]  }
  0x10   :  { %s21_s26 = sshll.u32 %s501_s25, 4  ;;  %s42_s28 = sshll.u32 %s502_s27, 4  ;;  %s22_s26 = int_to_ptr.vmem [resolvable:$true] %s21_s26  ;;  %s43_s28 = int_to_ptr.vmem [resolvable:$true] %s42_s28 }
  0x11   :  { %s418_s29 = scalar_lea.vmem %s22_s26, 32  ;;  %p423_p6 = scmp.lt.s32.totalorder %s22_s26, %s22_s26 }
  0x12   :  { %p419_p5 = scmp.ne.s32.totalorder %s22_s26, %s418_s29  ;;  %p424_p7 = scmp.lt.s32.totalorder %s418_s29, %s418_s29 }
  0x14   :  { %p425_p8 = por %p424_p7, %p423_p6 }
  0x16   :  { %p426_p9 = pnand %p425_p8, %p419_p5 }
  0x18   :  { %429 = shalt.err (!%p426_p9)
}
  0x19   :  { %24 = dma.hbm_to_vmem [thread:$0]  %s576_s0, 32, %s22_s26, [#allocation3]  }
  0x1a   :  { %s438_s7 = scalar_lea.vmem %s43_s28, 512  ;;  %p443_p11 = scmp.lt.s32.totalorder %s43_s28, %s43_s28 }
  0x1b   :  { %p439_p10 = scmp.ne.s32.totalorder %s43_s28, %s438_s7  ;;  %p444_p12 = scmp.lt.s32.totalorder %s438_s7, %s438_s7 }
  0x1d   :  { %p445_p13 = por %p444_p12, %p443_p11 }
  0x1f   :  { %p446_p0 = pnand %p445_p13, %p439_p10 }
  0x21   :  { %449 = shalt.err (!%p446_p0)
}
  0x22   :  { %48 = dma.hbm_to_vmem [thread:$0]  %s578_s2, 512, %s43_s28, [#allocation6], %s499_s21, %s499_s21, %s500_s22  }
  0x23   :  { %490 = dma.done.wait [#allocation3], 32  }
  0x24   :  { %491 = vsyncadd [#allocation3], 4294967264 }
  0x25   :  { %492 = dma.done.wait [#allocation6], 768  }
  0x26   :  { %493 = vsyncadd [#allocation6], 4294966528  ;;  %vm66_vm0 = vcmask 261120   ;;  %v65_v0 = vld [vmem:[#allocation7 + $0x18] sm:$0xff]  ;;  %v64_v1 = vld [vmem:[#allocation7 + $0x10] sm:$0xff]  ;;  %v161_v8 = vlaneseq  ;;  %vm213_vm1 = vcmask 1041409  }
  0x27   :  { %356 = vmatprep.subr.mxu0 %v65_v0  ;;  %v546_v2 = vld [vmem:[#allocation5] sm:$0xff]  ;;  %v63_v3 = vld [vmem:[#allocation7 + $0x8] sm:$0xff]  ;;  %v62_v4 = vld [vmem:[#allocation7] sm:$0xff]  ;;  %v503_v6 = vmov 1966171168   ;;  %vm216_vm2 = vcmask 58368  }
  0x28   :  { %357 = vmatpush3.msra.mxu0 %v65_v0  ;;  %364 = vmatprep.mubr.msk.f32.mxu0 %vm66_vm0, %v546_v2  ;;  %v550_v5 = vld [vmem:[#allocation5 + $0x8] sm:$0xff]  ;;  %v159_v7 = vunpack.c.l.s4 %v503_v6  ;;  %v162_v10 = vshrl.u32 %v161_v8, 7  ;;  %v348_v11 = vld.sshfl [vmem:[#allocation2] sm:$0x11 pattern:$0x75316420] }
  0x29   :  { %358 = vmatprep.subr.mxu0 %v64_v1  ;;  %v157_v12 = vcombine.high %v348_v11, %v348_v11  ;;  %v349_v25 = vld [vmem:[%s579_s3] ss:$0 sm:$0xff]  ;;  %v204_v30 = vand.u32 127, %v161_v8  ;;  %v504_v38 = vmov 0   ;;  %s505_s3 = smov [#allocation9]  }
  0x2a   :  { %359 = vmatpush3.msra.mxu0 %v64_v1  ;;  %v160_v9 = vunpack.c.0.s8 %v159_v7  ;;  %v174_v15 = vsub.s32 0, %v162_v10  ;;  %377 = vset.pattern.permute.xlu0 %v504_v38  ;;  %v227_v39 = vsub.s32 1, %v162_v10  ;;  %s332_s9 = sshll.u32 %s505_s3, 4  ;;  %s333_s9 = int_to_ptr.vmem [resolvable:$true] %s332_s9 }
  0x2b   :  { %360 = vmatprep.subr.mxu0 %v63_v3  ;;  %v207_v32 = vsub.s32 %v204_v30, %v162_v10  ;;  %376 = vset.pattern.permute.xlu1 %v504_v38  ;;  %s450_s10 = scalar_lea.vmem %s333_s9, 32  ;;  %p455_p2 = scmp.lt.s32.totalorder %s333_s9, %s333_s9 }
  0x2c   :  { %361 = vmatpush3.msra.mxu0 %v63_v3  ;;  %v163_v13 = vsub.s32 %v160_v9, %v162_v10  ;;  %p451_p1 = scmp.ne.s32.totalorder %s333_s9, %s450_s10  ;;  %p456_p3 = scmp.lt.s32.totalorder %s450_s10, %s450_s10 }
  0x2d   :  { %362 = vmatprep.subr.mxu0 %v62_v4 }
  0x2e   :  { %363 = vmatpush3.msra.mxu0 %v62_v4  ;;  %v171_v14 = vrot.slane %v157_v12, %v163_v13  ;;  %v164_v16 = vrot.slane %v348_v11, %v163_v13  ;;  %p457_p4 = por %p456_p3, %p455_p2 }
  0x2f   :  { %365 = vmatmul.mubr.msk.f32.vlgmr.msra.gmra.mxu0 %vm66_vm0, %v550_v5 }
  0x30   :  { %v179_v17 = vrot.slane %v171_v14, %v174_v15  ;;  %v175_v18 = vrot.slane %v164_v16, %v174_v15  ;;  %p458_p5 = pnand %p457_p4, %p451_p1 }
  0xef   :  { %v366_v19 = vpop.f32.mrf.mxu0 }
  0xf0   :  { %v183_v20 = vadd.f32 %v366_v19, %v179_v17 }
  0xf1   :  { %v139_v21 = vpop.f32.mrf.mxu0 }
  0xf2   :  { %v182_v22 = vadd.f32 %v175_v18, %v139_v21  ;;  %378 = vtanh.f32 %v183_v20 }
  0xf4   :  { %380 = vtanh.f32 %v182_v22 }
  0xff   :  { %v379_v23 = vpop.eup %378 }
 0x100   :  { %v194_v28 = vmul.f32 %v379_v23, %v349_v25 }
 0x101   :  { %v381_v24 = vpop.eup %380 }
 0x102   :  { %v193_v26 = vmul.f32 %v381_v24, %v349_v25  ;;  %v198_v29 = vsel %vm66_vm0, %v194_v28, 0.0 }
 0x104   :  { %v195_v27 = vsel %vm66_vm0, %v193_v26, 0.0 }
 0x105   :  { %196 = vadd.xlane.f32.xlu0 %v195_v27 }
 0x109   :  { %199 = vadd.xlane.f32.xlu0 %v198_v29 }
 0x18e   :  { %v197_v31 = vpop.xlane.xlu0 %196 }
 0x18f   :  { %v208_v34 = vrot.slane %v197_v31, %v207_v32 }
 0x192   :  { %v200_v33 = vpop.xlane.xlu0 %199 }
 0x193   :  { %v212_v35 = vrot.slane %v200_v33, %v207_v32 }
 0x195   :  { %v214_v36 = vsel %vm213_vm1, %v212_v35, %v208_v34 }
 0x196   :  { %v217_v37 = vsel %vm216_vm2, %v214_v36, -inf }
 0x197   :  { %218 = vmax.xlane.f32.xlu1 %v217_v37 }
 0x220   :  { %v219_v40 = vpop.xlane.xlu1 %218 }
 0x221   :  { %v224_v41 = vrot.slane %v219_v40, %v174_v15  ;;  %v228_v42 = vrot.slane %v219_v40, %v227_v39 }
 0x223   :  { %v231_v43 = vsub.f32 %v197_v31, %v224_v41  ;;  %v232_v44 = vsub.f32 %v200_v33, %v228_v42 }
 0x225   :  { %v233_v45 = vmul.f32 1.442695, %v231_v43  ;;  %v235_v46 = vmul.f32 1.442695, %v232_v44 }
 0x227   :  { %382 = vpow2.f32 %v233_v45 }
 0x228   :  { %384 = vpow2.f32 %v235_v46 }
 0x234   :  { %v383_v47 = vpop.eup %382 }
 0x235   :  { %v385_v48 = vpop.eup %384  ;;  %240 = vperm.xlu1 %376, %v383_v47  }
 0x236   :  { %243 = vperm.xlu0 %377, %v385_v48  }
 0x2b0   :  { %v241_v49 = vpop.permute.xlu1 %240 }
 0x2b1   :  { %v244_v50 = vpop.permute.xlu0 %243  ;;  %v248_v51 = vrot.slane %v241_v49, %v207_v32 }
 0x2b2   :  { %v252_v52 = vrot.slane %v244_v50, %v207_v32 }
 0x2b4   :  { %v253_v53 = vsel %vm213_vm1, %v252_v52, %v248_v51 }
 0x2b5   :  { %v255_v54 = vsel %vm216_vm2, %v253_v53, 0.0 }
 0x2b6   :  { %256 = vadd.xlane.f32.xlu1 %v255_v54 }
 0x33f   :  { %v257_v55 = vpop.xlane.xlu1 %256 }
 0x340   :  { %v262_v56 = vrot.slane %v257_v55, %v174_v15  ;;  %v266_v57 = vrot.slane %v257_v55, %v227_v39 }
 0x342   :  { %386 = vrcp.f32 %v262_v56 }
 0x343   :  { %388 = vrcp.f32 %v266_v57 }
 0x34f   :  { %v387_v58 = vpop.eup %386 }
 0x350   :  { %v270_v59 = vmul.f32 %v387_v58, %v383_v47  ;;  %v389_v60 = vpop.eup %388 }
 0x351   :  { %v272_v61 = vmul.f32 %v389_v60, %v385_v48 }
 0x352   :  { %276 = vperm.xlu0 %377, %v270_v59  }
 0x356   :  { %279 = vperm.xlu0 %377, %v272_v61  }
 0x3cd   :  { %v277_v62 = vpop.permute.xlu0 %276 }
 0x3ce   :  { %v294_v63 = vmul.f32 %v277_v62, %v546_v2  ;;  %v284_v4 = vrot.slane %v277_v62, %v207_v32 }
 0x3d0   :  { %v296_v0 = vsel %vm66_vm0, %v294_v63, 0.0 }
 0x3d1   :  { %v297_v1 = vrot.slane %v296_v0, 4  ;;  %v280_v3 = vpop.permute.xlu0 %279 }
 0x3d2   :  { %v288_v6 = vrot.slane %v280_v3, %v207_v32  ;;  %v295_v7 = vmul.f32 %v280_v3, %v550_v5 }
 0x3d3   :  { %v298_v8 = vadd.f32 %v297_v1, %v296_v0 }
 0x3d4   :  { %v303_v9 = vsel %vm66_vm0, %v295_v7, 0.0  ;;  %v289_v10 = vsel %vm213_vm1, %v288_v6, %v284_v4 }
 0x3d5   :  { %v299_v11 = vrot.slane %v298_v8, 2  ;;  %v304_v12 = vrot.slane %v303_v9, 4  ;;  %291 = vst.msk [vmem:[#allocation9] sm:$0x3] %vm216_vm2, %v289_v10 }
 0x3d6   :  { %461 = shalt.err (!%p458_p5)
}
 0x3d7   :  { %335 = dma.vmem_to_hbm [thread:$0]  %s333_s9, 32, %s581_s5, [#allocation10]   ;;  %v300_v2 = vadd.f32 %v299_v11, %v298_v8  ;;  %v305_v5 = vadd.f32 %v304_v12, %v303_v9  ;;  %vm314_vm3 = vcmask 254976  }
 0x3d8   :  { %s506_s13 = smov [#allocation8]  }
 0x3d9   :  { %v306_v13 = vrot.slane %v305_v5, 2  ;;  %v301_v14 = vrot.slane %v300_v2, 1  ;;  %s322_s14 = sshll.u32 %s506_s13, 4  ;;  %s323_s14 = int_to_ptr.vmem [resolvable:$true] %s322_s14 }
 0x3da   :  { %s470_s15 = scalar_lea.vmem %s323_s14, 32  ;;  %p475_p7 = scmp.lt.s32.totalorder %s323_s14, %s323_s14 }
 0x3db   :  { %v307_v15 = vadd.f32 %v306_v13, %v305_v5  ;;  %v302_v18 = vadd.f32 %v301_v14, %v300_v2  ;;  %p471_p6 = scmp.ne.s32.totalorder %s323_s14, %s470_s15  ;;  %p476_p8 = scmp.lt.s32.totalorder %s470_s15, %s470_s15 }
 0x3dd   :  { %v308_v16 = vrot.slane %v307_v15, 1  ;;  %p477_p9 = por %p476_p8, %p475_p7 }
 0x3df   :  { %v309_v17 = vadd.f32 %v308_v16, %v307_v15  ;;  %p478_p10 = pnand %p477_p9, %p471_p6 }
 0x3e1   :  { %v312_v19 = vsel %vm213_vm1, %v309_v17, %v302_v18 }
 0x3e2   :  { %315 = vst.msk [vmem:[#allocation8] sm:$0x3] %vm314_vm3, %v312_v19 }
 0x3e3   :  { %481 = shalt.err (!%p478_p10)
}
 0x3e4   :  { %325 = dma.vmem_to_hbm [thread:$0]  %s323_s14, 32, %s580_s4, [#allocation4]  }
 0x3e5   :  { %494 = dma.done.wait [#allocation4], 32  }
 0x3e6   :  { %495 = vsyncadd [#allocation4], 4294967264 }
 0x3e7   :  { %496 = dma.done.wait [#allocation10], 32  }
 0x3e8   :  { %497 = vsyncadd [#allocation10], 4294967264 }
 0x3e9   :  { %342 = vsyncpa [#allocation3], 1 }
 0x3ea   :  { %343 = vsyncpa [#allocation6], 1 }
 0x3eb   :  { %344 = vsyncpa [#allocation4], 1 }
 0x3ec   :  { %345 = vsyncpa [#allocation10], 1 }

</bundles_post_ra>
